<compile_context>
chip_gen: v6e
topology: v6e:2x2x1
jax: 0.10.0
libtpu: 0.0.40
codegen_flags: <defaults>
</compile_context>

<pallas_src>
import functools

import jax
import jax.numpy as jnp
from jax.experimental import pallas as pl
from jax.experimental.pallas import tpu as pltpu


def _smooth_onehot_kernel(idx_ref, out_ref, *, label_smoothing, num_classes):
    """Deterministic label smoothing: onehot * (1-s) + s/C (C = global num_classes)."""
    tb, c = out_ref.shape
    cls = jax.lax.broadcasted_iota(jnp.int32, (tb, c), 1)      # class id per lane
    onehot = (cls == idx_ref[...]).astype(jnp.float32)         # scatter_ equivalent
    smooth_pos = jnp.float32(1.0 - label_smoothing)
    smooth_neg = jnp.float32(label_smoothing / num_classes)    # use GLOBAL num_classes
    out_ref[...] = onehot * smooth_pos + smooth_neg


def _smooth_onehot_random_kernel(idx_ref, noise_ref, out_ref, *, label_smoothing):
    """Random off-target smoothing: U(0.1,1.0) noise on negatives, row-normalised."""
    tb, c = out_ref.shape
    cls = jax.lax.broadcasted_iota(jnp.int32, (tb, c), 1)
    onehot = (cls == idx_ref[...]).astype(jnp.float32)
    negatives = jnp.float32(1.0) - onehot

    noise = noise_ref[...] * negatives
    row_sum = jnp.sum(noise, axis=1, keepdims=True)            # (tb, 1) XLU reduce
    # One scalar per row (s / row_sum), then a single VPU multiply over the tile.
    scale = jnp.float32(label_smoothing) / row_sum

    out_ref[...] = onehot * jnp.float32(1.0 - label_smoothing) + noise * scale


def _choose_tile_b(batch_size, num_classes, target_block_bytes):
    """Largest batch tile (multiple of 8) whose f32 output block stays under target."""
    bytes_per_row = num_classes * 4
    rows = max(8, target_block_bytes // bytes_per_row)
    rows = (rows // 8) * 8
    if rows >= batch_size:
        return batch_size          # single full-extent block (always layout-legal)
    return rows                    # multiple of 8, C stays whole → (8,128)-legal


class SmoothOneHot:
    """JAX/Pallas port of the PyTorch SmoothOneHot module (forward pass)."""

    def __init__(self, label_smoothing, random_off_targets=False):
        self._label_smoothing = float(label_smoothing)
        self._random_off_targets = bool(random_off_targets)

    def __call__(self, indices, num_classes, key=None):
        batch_size = indices.shape[0]
        idx2d = indices.astype(jnp.int32).reshape(batch_size, 1)
        out_shape = jax.ShapeDtypeStruct((batch_size, num_classes), jnp.float32)
        cparams = pltpu.CompilerParams(dimension_semantics=("parallel",))

        if not self._random_off_targets:
            # Only the output is streamed: ~4 MiB per block (x2 buffers) fits every gen.
            tile_b = _choose_tile_b(batch_size, num_classes, target_block_bytes=4 << 20)
            grid = (pl.cdiv(batch_size, tile_b),)
            kernel = functools.partial(
                _smooth_onehot_kernel,
                label_smoothing=self._label_smoothing,
                num_classes=num_classes)
            cost = pl.CostEstimate(
                flops=2 * batch_size * num_classes,
                transcendentals=0,
                bytes_accessed=batch_size * num_classes * 4 + batch_size * 4)
            return pl.pallas_call(
                kernel,
                out_shape=out_shape,
                grid=grid,
                in_specs=[pl.BlockSpec((tile_b, 1), lambda i: (i, 0))],
                out_specs=pl.BlockSpec((tile_b, num_classes), lambda i: (i, 0)),
                compiler_params=cparams,
                cost_estimate=cost,
            )(idx2d)
        else:
            if key is None:
                key = jax.random.PRNGKey(0)
            # TODO(synk): the in-kernel hardware PRNG (pltpu.prng_seed/prng_random_bits)
            # has no CPU-interpret lowering in this environment, so the U(0.1, 1.0)
            # noise is generated with jax.random and streamed through the same
            # batch-tiled pipeline (noise block matches the output block).
            noise = jax.random.uniform(
                key, (batch_size, num_classes), dtype=jnp.float32,
                minval=0.1, maxval=1.0)
            # Noise input + output are both streamed → smaller per-block budget.
            tile_b = _choose_tile_b(batch_size, num_classes, target_block_bytes=2 << 20)
            grid = (pl.cdiv(batch_size, tile_b),)
            kernel = functools.partial(
                _smooth_onehot_random_kernel,
                label_smoothing=self._label_smoothing)
            cost = pl.CostEstimate(
                flops=6 * batch_size * num_classes,
                transcendentals=0,
                bytes_accessed=2 * batch_size * num_classes * 4 + batch_size * 4)
            return pl.pallas_call(
                kernel,
                out_shape=out_shape,
                grid=grid,
                in_specs=[pl.BlockSpec((tile_b, 1), lambda i: (i, 0)),
                          pl.BlockSpec((tile_b, num_classes), lambda i: (i, 0))],
                out_specs=pl.BlockSpec((tile_b, num_classes), lambda i: (i, 0)),
                compiler_params=cparams,
                cost_estimate=cost,
            )(idx2d, noise)


if __name__ == "__main__":
    key = jax.random.PRNGKey(0)
    k_idx, k_noise = jax.random.split(key)
    batch_size, num_classes = 8, 16
    label_smoothing = 0.1

    indices = jax.random.randint(k_idx, (batch_size,), 0, num_classes, dtype=jnp.int32)

    # --- deterministic mode ---
    mod = SmoothOneHot(label_smoothing, random_off_targets=False)
    out = jax.block_until_ready(mod(indices, num_classes))

    onehot_ref = jax.nn.one_hot(indices, num_classes, dtype=jnp.float32)
    ref = onehot_ref * (1.0 - label_smoothing) + label_smoothing / num_classes
    assert out.shape == (batch_size, num_classes)
    assert out.dtype == jnp.float32
    assert jnp.allclose(out, ref, atol=1e-6), "deterministic mode mismatch"

    # --- random off-target mode ---
    mod_rand = SmoothOneHot(label_smoothing, random_off_targets=True)
    out_rand = jax.block_until_ready(mod_rand(indices, num_classes, key=k_noise))
    assert out_rand.shape == (batch_size, num_classes)
    # positives carry exactly (1 - s); off-target noise sums to s per row
    pos_vals = jnp.sum(out_rand * onehot_ref, axis=1)
    neg_sums = jnp.sum(out_rand * (1.0 - onehot_ref), axis=1)
    assert jnp.allclose(pos_vals, 1.0 - label_smoothing, atol=1e-5)
    assert jnp.allclose(neg_sums, label_smoothing, atol=1e-5)
    assert jnp.allclose(jnp.sum(out_rand, axis=1), 1.0, atol=1e-5)

    print("KERNEL_OK")
</pallas_src>

<mosaic_0001>
module attributes {stable_mosaic.version = 11 : i64} {
  func.func @_smooth_onehot_kernel(%arg0: i32, %arg1: memref<8x1xi32, #tpu.memory_space<vmem>>, %arg2: memref<8x16xf32, #tpu.memory_space<vmem>>) attributes {dimension_semantics = [#tpu.dimension_semantics<parallel>], iteration_bounds = array<i64: 1>, scalar_prefetch = 0 : i64, scratch_operands = 0 : i64, tpu.core_type = #tpu.core_type<tc>, window_params = [{transform_indices = @transform_0, window_bounds = array<i64: 8, 1>}, {transform_indices = @transform_1, window_bounds = array<i64: 8, 16>}]} {
    %0 = tpu.iota {dimensions = array<i32: 1>} : vector<8x16xi32>
    %c0 = arith.constant 0 : index
    %c0_0 = arith.constant 0 : index
    %1 = vector.load %arg1[%c0, %c0_0] : memref<8x1xi32, #tpu.memory_space<vmem>>, vector<8x1xi32>
    %2 = vector.broadcast %1 : vector<8x1xi32> to vector<8x16xi32>
    %3 = arith.cmpi eq, %0, %2 : vector<8x16xi32>
    %4 = arith.extui %3 : vector<8x16xi1> to vector<8x16xi32>
    %5 = arith.sitofp %4 : vector<8x16xi32> to vector<8x16xf32>
    %cst = arith.constant 0.899999976 : f32
    %6 = vector.broadcast %cst : f32 to vector<8x16xf32>
    %7 = arith.mulf %5, %6 : vector<8x16xf32>
    %cst_1 = arith.constant 6.250000e-03 : f32
    %8 = vector.broadcast %cst_1 : f32 to vector<8x16xf32>
    %9 = arith.addf %7, %8 : vector<8x16xf32>
    %c0_2 = arith.constant 0 : index
    %c0_3 = arith.constant 0 : index
    %10 = vector.load %arg2[%c0_2, %c0_3] : memref<8x16xf32, #tpu.memory_space<vmem>>, vector<8x16xf32>
    tpu.vector_store %arg2[%c0_2, %c0_3], %9 {strides = array<i32>} : memref<8x16xf32, #tpu.memory_space<vmem>>, vector<8x16xf32>,
    return
  }
  func.func @transform_0(%arg0: i32) -> (i32, i32) {
    %c0_i32 = arith.constant 0 : i32
    %c0_i32_0 = arith.constant 0 : i32
    return %arg0, %c0_i32 : i32, i32
  }
  func.func @transform_1(%arg0: i32) -> (i32, i32) {
    %c0_i32 = arith.constant 0 : i32
    %c0_i32_0 = arith.constant 0 : i32
    return %arg0, %c0_i32 : i32, i32
  }
}

</mosaic_0001>

<bundles_post_ra>
// kernel: tpu_custom_call.1
= control target key start
LH: loop header
LB: loop body
LE: loop exit
PB: predicated region body
PF: predicated region fallthrough
CT: control target
= control target key end

     0   :  { %s82_s0 = inlined_call_operand.vmem [shape: s32[8,1], index: 0, kind: input, shape index: {}]   ;;  %s83_s1 = inlined_call_operand.hbm [shape: f32[8,16], index: 1, kind: output, shape index: {}]  }
   0x1   :  { %v11_v0 = vld [vmem:[%s82_s0] sm:$0xff] }
   0x2   :  { %6 = vsyncpa [#allocation3], 0  ;;  %v63_v1 = vmov 0   ;;  %v9_v2 = vlaneseq  ;;  %v64_v5 = vmov 0.0   ;;  %s65_s8 = smov [#allocation2]   ;;  %vm20_vm1 = vcmask 130048  }
   0x3   :  { %40 = vset.pattern.permute.xlu0 %v63_v1  ;;  %s28_s9 = sshll.u32 %s65_s8, 4  ;;  %s29_s9 = int_to_ptr.vmem [resolvable:$true] %s28_s9 }
   0x4   :  { %13 = vperm.xlu0 %40, %v11_v0   ;;  %v10_v3 = vand.u32 127, %v9_v2  ;;  %s41_s10 = scalar_lea.vmem %s29_s9, 128  ;;  %p46_p1 = scmp.lt.s32.totalorder %s29_s9, %s29_s9 }
   0x5   :  { %p42_p0 = scmp.ne.s32.totalorder %s29_s9, %s41_s10  ;;  %p47_p2 = scmp.lt.s32.totalorder %s41_s10, %s41_s10 }
   0x7   :  { %p48_p3 = por %p47_p2, %p46_p1 }
   0x9   :  { %p49_p4 = pnand %p48_p3, %p42_p0 }
  0x7f   :  { %v14_v4 = vpop.permute.xlu0 %13 }
  0x80   :  { %vm15_vm0 = vcmp.eq.s32.totalorder %v10_v3, %v14_v4 }
  0x81   :  { %v36_v6 = vsel %vm15_vm0, 1.0, %v64_v5 }
  0x82   :  { %v18_v7 = vmul.f32 0.9, %v36_v6 }
  0x84   :  { %v19_v8 = vadd.f32 0.00625, %v18_v7 }
  0x86   :  { %21 = vst.msk [vmem:[#allocation2] sm:$0xff] %vm20_vm1, %v19_v8 }
  0x87   :  { %52 = shalt.err (!%p49_p4)
}
  0x88   :  { %31 = dma.vmem_to_hbm [thread:$0]  %s29_s9, 128, %s83_s1, [#allocation3]  }
  0x89   :  { %61 = dma.done.wait [#allocation3], 128  }
  0x8a   :  { %62 = vsyncadd [#allocation3], 4294967168 }
  0x8b   :  { %35 = vsyncpa [#allocation3], 1 }

</bundles_post_ra>
